<compile_context>
chip_gen: v7x
topology: tpu7x:2x2x1
jax: 0.10.0
libtpu: 0.0.40
codegen_flags: <defaults>
</compile_context>

<pallas_src>
import jax
import jax.numpy as jnp
from jax.experimental import pallas as pl
from jax.experimental.pallas import tpu as pltpu

X_COLUMNS = ['real_disp_inc_growth', 'real_gdp_growth', 'cpi_inflation_rate',
             'spread_treasury_10y_over_3m', 'spread_treasury_5y_over_3m',
             'treasury_3m_rate_diff', 'treasury_5y_rate_diff',
             'treasury_10y_rate_diff', 'bbb_rate_diff', 'mortgage_rate_diff',
             'vix_diff', 'dwcf_growth', 'hpi_growth', 'crei_growth',
             'q1', 'q2', 'q3', 'q4']
X_SIZE = len(X_COLUMNS)  # 18

_DEFAULT_TB = 2048  # rows per grid step (multiple of 8); ~1 MiB f32 tile after lane padding


def _linear_kernel(x_ref, w_ref, b_ref, o_ref):
    # x_ref: (TB, F) f32 VMEM tile, w_ref: (F, 1) f32 VMEM (resident),
    # b_ref: (1, 1) f32 SMEM scalar, o_ref: (TB, 1) f32 VMEM tile.
    acc = jnp.dot(x_ref[...], w_ref[...], preferred_element_type=jnp.float32)
    o_ref[...] = (acc + b_ref[0, 0]).astype(o_ref.dtype)


def linear_forward(x, weight, bias, *, block_rows=_DEFAULT_TB):
    """Pallas equivalent of torch.nn.Linear(x_size, 1): y = x @ W^T + b.

    x:      (B, F) float32
    weight: (1, F) float32   (PyTorch convention: (out_features, in_features))
    bias:   (1,)   float32
    returns (B, 1) float32
    """
    B, F = x.shape

    w_t = weight.T.astype(jnp.float32)        # (F, 1): lane dim carries out_features
    b2 = bias.reshape(1, 1).astype(jnp.float32)

    # Full-array block for small B (legal for any B), fixed multiple-of-8 tile
    # for large B; Pallas masks the ragged tail block.
    tb = B if B <= block_rows else block_rows
    grid = (pl.cdiv(B, tb),)

    return pl.pallas_call(
        _linear_kernel,
        out_shape=jax.ShapeDtypeStruct((B, 1), jnp.float32),
        grid=grid,
        in_specs=[
            pl.BlockSpec((tb, F), lambda i: (i, 0)),                    # x: batch-tiled, native dtype
            pl.BlockSpec((F, 1), lambda i: (0, 0)),                     # weight: VMEM-resident
            pl.BlockSpec(memory_space=pltpu.MemorySpace.SMEM),          # bias: scalar in SMEM
        ],
        out_specs=pl.BlockSpec((tb, 1), lambda i: (i, 0)),
        compiler_params=pltpu.CompilerParams(
            dimension_semantics=("parallel",),
        ),
    )(x, w_t, b2)


def init_params(key, in_features, out_features=1):
    # Deterministic init mirroring torch.nn.Linear default: U(-1/sqrt(in), 1/sqrt(in)).
    kw, kb = jax.random.split(key)
    bound = 1.0 / jnp.sqrt(jnp.float32(in_features))
    weight = jax.random.uniform(kw, (out_features, in_features),
                                dtype=jnp.float32, minval=-bound, maxval=bound)
    bias = jax.random.uniform(kb, (out_features,),
                              dtype=jnp.float32, minval=-bound, maxval=bound)
    return weight, bias


if __name__ == "__main__":
    key = jax.random.PRNGKey(0)
    k_x, k_p, k_x2 = jax.random.split(key, 3)

    weight, bias = init_params(k_p, X_SIZE)

    # Small-batch path (single full-array block), matching the module's usage.
    batch = 8
    x = jax.random.normal(k_x, (batch, X_SIZE), dtype=jnp.float32)
    out = linear_forward(x, weight, bias)
    jax.block_until_ready(out)
    assert out.shape == (batch, 1)
    ref = x @ weight.T + bias
    assert jnp.allclose(out, ref, atol=1e-5, rtol=1e-5), "small-batch mismatch"

    # Multi-tile path with a ragged tail (exercises the batch-tiled grid).
    big_batch = 4100
    x_big = jax.random.normal(k_x2, (big_batch, X_SIZE), dtype=jnp.float32)
    out_big = linear_forward(x_big, weight, bias)
    jax.block_until_ready(out_big)
    ref_big = x_big @ weight.T + bias
    assert out_big.shape == (big_batch, 1)
    assert jnp.allclose(out_big, ref_big, atol=1e-5, rtol=1e-5), "tiled-batch mismatch"

    print("KERNEL_OK")
</pallas_src>

<mosaic_0001>
module attributes {stable_mosaic.version = 11 : i64} {
  func.func @_linear_kernel(%arg0: i32, %arg1: memref<8x18xf32, #tpu.memory_space<vmem>>, %arg2: memref<18x1xf32, #tpu.memory_space<vmem>>, %arg3: memref<1x1xf32, #tpu.memory_space<smem>>, %arg4: memref<8x1xf32, #tpu.memory_space<vmem>>) attributes {dimension_semantics = [#tpu.dimension_semantics<parallel>], iteration_bounds = array<i64: 1>, scalar_prefetch = 0 : i64, scratch_operands = 0 : i64, tpu.core_type = #tpu.core_type<tc>, window_params = [{transform_indices = @transform_0, window_bounds = array<i64: 8, 18>}, {pipeline_mode = #tpu.pipeline_mode<synchronous>, transform_indices = @transform_1, window_bounds = array<i64: 18, 1>}, {transform_indices = @transform_2, window_bounds = array<i64: 1, 1>}, {transform_indices = @transform_3, window_bounds = array<i64: 8, 1>}]} {
    %c0 = arith.constant 0 : index
    %c0_0 = arith.constant 0 : index
    %0 = vector.load %arg1[%c0, %c0_0] : memref<8x18xf32, #tpu.memory_space<vmem>>, vector<8x18xf32>
    %c0_1 = arith.constant 0 : index
    %c0_2 = arith.constant 0 : index
    %1 = vector.load %arg2[%c0_1, %c0_2] : memref<18x1xf32, #tpu.memory_space<vmem>>, vector<18x1xf32>
    %cst = arith.constant dense<0.000000e+00> : vector<8x1xf32>
    %2 = tpu.matmul %0, %1, %cst {dimension_numbers = #tpu.dot_dimension_numbers<[1], [0], [0], [1], [0, 0, 1, 1], [], []>} : vector<8x18xf32>, vector<18x1xf32>, vector<8x1xf32> -> vector<8x1xf32>
    %c0_3 = arith.constant 0 : index
    %c0_4 = arith.constant 0 : index
    %3 = memref.load %arg3[%c0_3, %c0_4] : memref<1x1xf32, #tpu.memory_space<smem>>
    %4 = vector.broadcast %3 : f32 to vector<8x1xf32>
    %5 = arith.addf %2, %4 : vector<8x1xf32>
    %c0_5 = arith.constant 0 : index
    %c0_6 = arith.constant 0 : index
    %6 = vector.load %arg4[%c0_5, %c0_6] : memref<8x1xf32, #tpu.memory_space<vmem>>, vector<8x1xf32>
    tpu.vector_store %arg4[%c0_5, %c0_6], %5 {strides = array<i32>} : memref<8x1xf32, #tpu.memory_space<vmem>>, vector<8x1xf32>,
    return
  }
  func.func @transform_0(%arg0: i32) -> (i32, i32) {
    %c0_i32 = arith.constant 0 : i32
    %c0_i32_0 = arith.constant 0 : i32
    return %arg0, %c0_i32 : i32, i32
  }
  func.func @transform_1(%arg0: i32) -> (i32, i32) {
    %c0_i32 = arith.constant 0 : i32
    %c0_i32_0 = arith.constant 0 : i32
    %c0_i32_1 = arith.constant 0 : i32
    return %c0_i32, %c0_i32_0 : i32, i32
  }
  func.func @transform_2(%arg0: i32) -> (i32, i32) {
    %c0_i32 = arith.constant 0 : i32
    %c0_i32_0 = arith.constant 0 : i32
    %c0_i32_1 = arith.constant 0 : i32
    return %c0_i32, %c0_i32_0 : i32, i32
  }
  func.func @transform_3(%arg0: i32) -> (i32, i32) {
    %c0_i32 = arith.constant 0 : i32
    %c0_i32_0 = arith.constant 0 : i32
    return %arg0, %c0_i32 : i32, i32
  }
}

</mosaic_0001>

<bundles_post_ra>
// kernel: tpu_custom_call.1
= control target key start
LH: loop header
LB: loop body
LE: loop exit
PB: predicated region body
PF: predicated region fallthrough
CT: control target
= control target key end

     0   :  { %v126_v0 = vmov 0.0|0.0   ;;  %vm127_vm0 = vmmov 0   ;;  %v128_v3 = vmov 0.0   ;;  %vm25_vm1 = vcmask 1041408   ;;  %s167_s1 = inlined_call_operand.vmem [shape: f32[18,1], index: 1, kind: input, shape index: {}]   ;;  %s168_s0 = inlined_call_operand.vmem [shape: f32[8,18], index: 0, kind: input, shape index: {}]   ;;  %s169_s2 = inlined_call_operand.<no memory space> [shape: f32[1,1], index: 2, kind: input, shape index: {}]   ;;  %s170_s3 = inlined_call_operand.vmem [shape: f32[8,1], index: 3, kind: output, shape index: {}]  }
   0x1   :  { %120 = vmatprep.subr.bf16.mxu0 %v126_v0  ;;  %v16_v1 = vld [vmem:[%s167_s1] sm:$0xff]  ;;  %v17_v2 = vld [vmem:[%s167_s1 + $0x8] sm:$0xff]  ;;  %117 = vmatprep.mubr.msk.f32.mxu0 %vm127_vm0, %v128_v3  ;;  %v18_v5 = vld [vmem:[%s167_s1 + $0x10] sm:$0x3]  ;;  %vm21_vm2 = vcmask 146432   ;;  %v20_v7 = vstv %s169_s2  ;;  %vm99_vm3 = vcmask 7168  }
   0x2   :  { %v121_v4 = vpack.c.bf16 %v17_v2, %v16_v1  ;;  %v15_v6 = vld [vmem:[%s168_s0] sm:$0xff] }
   0x4   :  { %122 = vmatpush3.bf16.msra.mxu0 %v121_v4 }
   0x5   :  { %115 = vmatprep.subr.mxu0 %v128_v3 }
   0x8   :  { %116 = vmatpush3.msk.msra.mxu0 %vm25_vm1, %v18_v5 }
   0x9   :  { %118 = vmatmul.mubr.msk.f32.vlgmr.msra.gmra.mrb[0].mxu0 %vm21_vm2, %v15_v6 }
  0xdc   :  { %v95_v8 = vpop.f32.mrb[0].mxu0 }
  0xdd   :  { %v96_v9 = vadd.f32 %v95_v8, %v20_v7  ;;  %v119_v10 = vpop.f32.mrb[1].mxu0 }
  0xdf   :  { %100 = vst.msk [vmem:[%s170_s3] sm:$0xff] %vm99_vm3, %v96_v9 }

</bundles_post_ra>
